<compile_context>
chip_gen: v7x
topology: tpu7x:2x2x1
jax: 0.10.0
libtpu: 0.0.40
codegen_flags: <defaults>
</compile_context>

<pallas_src>
import functools

import jax
import jax.numpy as jnp
import numpy as np
from jax.experimental import pallas as pl
from jax.experimental.pallas import tpu as pltpu

EPS = 1e-5


def _residual_block_kernel(x1_ref, w1s_ref, w2_ref, fold_ref, retile_ref,
                           bn_ref, out_ref, *, N, H, W, C, mm_dtype):
    R = N * H
    WC = W * C
    minv = 1.0 / float(N * H * W)

    fold = fold_ref[...]      # (WC, C)  f32: folds the W repeats of each channel
    retile = retile_ref[...]  # (C, WC)  f32: per-channel -> lane-tiled broadcast
    bn = bn_ref[...]          # (6, C)   f32: rows = [g1, b1, g2, b2, gs, bs]

    def dot32(a, b):
        return jnp.dot(a, b, preferred_element_type=jnp.float32)

    def batchnorm(acc, gamma, beta, relu):
        # Fused single-pass batch stats (biased variance, as BatchNorm2d training).
        s = jnp.sum(acc, axis=0, keepdims=True)        # (1, WC)
        q = jnp.sum(acc * acc, axis=0, keepdims=True)  # (1, WC)
        mean = dot32(s, fold) * minv                   # (1, C)
        ex2 = dot32(q, fold) * minv                    # (1, C)
        var = jnp.maximum(ex2 - mean * mean, 0.0)
        rstd = jax.lax.rsqrt(var + EPS)
        scale = dot32(gamma * rstd, retile)            # (1, WC) lane-tiled
        shift = dot32(beta - mean * gamma * rstd, retile)
        y = acc * scale + shift
        return jnp.maximum(y, 0.0) if relu else y

    # conv1 (3x3, pad 1) + the 1x1 shortcut conv share the same LHS: one MXU
    # matmul produces [conv1 | shortcut] on 256 output lanes.
    fused = dot32(x1_ref[...], w1s_ref[...])           # (R, 2*WC) f32
    acc1 = fused[:, :WC]
    sc = fused[:, WC:]

    y1 = batchnorm(acc1, bn[0:1], bn[1:2], relu=True)  # BN1 + ReLU, (R, WC) f32

    # conv2 (3x3, pad 1): the +/-1 row taps of y1 are single-row sublane shifts;
    # an iota mask zeroes the rows that crossed an image boundary (reproducing
    # the zero padding).  K-concatenate the three taps -> one banded matmul.
    rim = jax.lax.broadcasted_iota(jnp.int32, (N, H, WC), 1).reshape(R, WC)
    zrow = jnp.zeros((1, WC), jnp.float32)
    up = jnp.concatenate([zrow, y1[:R - 1, :]], axis=0)   # input row r-1
    dn = jnp.concatenate([y1[1:, :], zrow], axis=0)       # input row r+1
    up = jnp.where(rim >= 1, up, 0.0)
    dn = jnp.where(rim <= H - 2, dn, 0.0)
    a2 = jnp.concatenate([up, y1, dn], axis=1).astype(mm_dtype)   # (R, 3*WC)
    acc2 = dot32(a2, w2_ref[...])                         # (R, WC) f32

    main = batchnorm(acc2, bn[2:3], bn[3:4], relu=True)   # BN2 + ReLU
    short = batchnorm(sc, bn[4:5], bn[5:6], relu=False)   # BN3 (no ReLU)

    # Lane-dense (N*H, W*C) store: full-width, unmasked vst.
    out_ref[...] = main + short


def _banded_same_conv_weight(w, width):
    """HWIO (3,3,ci,co) -> (3*width*ci, width*co) K-stacked same-padding bands.

    band[dy*width*ci + b*ci + i, v*co + c] = w[dy, b - v + 1, i, c] when
    |b - v| <= 1 (else 0), so [row_{r-1} | row_r | row_{r+1}] @ band yields a
    whole conv output row; horizontal zero padding is implicit in the Toeplitz.
    """
    kh, kw, ci, co = w.shape
    sel = np.zeros((kw, width, width), np.float32)
    for dx in range(kw):
        for v in range(width):
            b = v + dx - 1
            if 0 <= b < width:
                sel[dx, b, v] = 1.0
    band = jnp.einsum("xbv,yxic->ybivc", jnp.asarray(sel), w)
    return band.reshape(kh * width * ci, width * co)


@functools.partial(jax.jit, static_argnames=("matmul_dtype",))
def residual_block(x, w1, g1, b1, w2, g2, b2, ws, gs, bs,
                   matmul_dtype=jnp.bfloat16):
    # x: (N, H, W, Ci) float32 NHWC; conv weights HWIO; BN affine params (1, C).
    N, H, W, Ci = x.shape
    C = w1.shape[-1]
    WC = W * C

    # ---- lane-dense layout plumbing, all wrapper-side (XLA) ------------------
    # conv1 LHS: rows r-1 | r | r+1 of x (zero rows at image edges), K-stacked.
    xr = x.reshape(N, H, W * Ci)
    zr = jnp.zeros((N, 1, W * Ci), x.dtype)
    x_up = jnp.concatenate([zr, xr[:, :H - 1]], axis=1)
    x_dn = jnp.concatenate([xr[:, 1:], zr], axis=1)
    x1cat = jnp.concatenate([x_up, xr, x_dn], axis=2)
    x1cat = x1cat.reshape(N * H, 3 * W * Ci).astype(matmul_dtype)

    # conv1 banded weights fused with the block-diagonal 1x1 shortcut weights:
    # output lanes [0, WC) = conv1, lanes [WC, 2*WC) = shortcut (only the centre
    # K band — the un-shifted row — is non-zero there).
    w1cat = _banded_same_conv_weight(w1, W)                       # (3*W*Ci, WC)
    wsb = jnp.einsum("wv,ic->wivc", jnp.eye(W, dtype=jnp.float32),
                     ws).reshape(W * Ci, WC)
    w1s = jnp.zeros((3 * W * Ci, 2 * WC), jnp.float32)
    w1s = w1s.at[:, :WC].set(w1cat)
    w1s = w1s.at[W * Ci:2 * W * Ci, WC:].set(wsb)
    w1s = w1s.astype(matmul_dtype)

    w2cat = _banded_same_conv_weight(w2, W).astype(matmul_dtype)  # (3*WC, WC)

    # Thin per-channel fold / retile constants for the fused BN statistics.
    fold = jnp.asarray(np.kron(np.ones((W, 1), np.float32),
                               np.eye(C, dtype=np.float32)))      # (WC, C)
    retile = jnp.asarray(np.kron(np.ones((1, W), np.float32),
                                 np.eye(C, dtype=np.float32)))    # (C, WC)

    bn = jnp.concatenate([g1, b1, g2, b2, gs, bs], axis=0).astype(jnp.float32)

    kernel = functools.partial(_residual_block_kernel, N=N, H=H, W=W, C=C,
                               mm_dtype=matmul_dtype)
    vmem = pl.BlockSpec(memory_space=pltpu.MemorySpace.VMEM)
    out2d = pl.pallas_call(
        kernel,
        out_shape=jax.ShapeDtypeStruct((N * H, WC), jnp.float32),
        in_specs=[vmem] * 6,
        out_specs=vmem,
        compiler_params=pltpu.CompilerParams(
            vmem_limit_bytes=32 * 1024 * 1024),
    )(x1cat, w1s, w2cat, fold, retile, bn)

    return out2d.reshape(N, H, W, C)


# ----------------------------- pure-JAX reference -----------------------------
def _ref_conv(x, w, pad):
    return jax.lax.conv_general_dilated(
        x, w, window_strides=(1, 1), padding=[(pad, pad), (pad, pad)],
        dimension_numbers=("NHWC", "HWIO", "NHWC"))


def _ref_bn(y, g, b, relu):
    mean = jnp.mean(y, axis=(0, 1, 2), keepdims=True)
    var = jnp.mean((y - mean) ** 2, axis=(0, 1, 2), keepdims=True)
    o = (y - mean) / jnp.sqrt(var + EPS) * g.reshape(1, 1, 1, -1) \
        + b.reshape(1, 1, 1, -1)
    return jnp.maximum(o, 0.0) if relu else o


def residual_block_ref(x, w1, g1, b1, w2, g2, b2, ws, gs, bs):
    m = _ref_bn(_ref_conv(x, w1, 1), g1, b1, relu=True)
    m = _ref_bn(_ref_conv(m, w2, 1), g2, b2, relu=True)
    s = _ref_bn(_ref_conv(x, ws.reshape(1, 1, *ws.shape), 0), gs, bs, relu=False)
    return m + s


# ------------------------------------ main ------------------------------------
if __name__ == "__main__":
    N, H, W = 2, 16, 16
    Cin, C = 4, 8   # main_conv_in / shortcut_conv_in share in_channels=Cin

    key = jax.random.PRNGKey(0)
    keys = jax.random.split(key, 10)

    x = jax.random.normal(keys[0], (N, H, W, Cin), jnp.float32)

    # deterministic synthetic parameters (HWIO conv weights, BN affine params)
    w1 = jax.random.normal(keys[1], (3, 3, Cin, C), jnp.float32) * 0.2
    w2 = jax.random.normal(keys[2], (3, 3, C, C), jnp.float32) * 0.2
    ws = jax.random.normal(keys[3], (Cin, C), jnp.float32) * 0.2
    g1 = 1.0 + 0.1 * jax.random.normal(keys[4], (1, C), jnp.float32)
    b1 = 0.1 * jax.random.normal(keys[5], (1, C), jnp.float32)
    g2 = 1.0 + 0.1 * jax.random.normal(keys[6], (1, C), jnp.float32)
    b2 = 0.1 * jax.random.normal(keys[7], (1, C), jnp.float32)
    gs = 1.0 + 0.1 * jax.random.normal(keys[8], (1, C), jnp.float32)
    bs = 0.1 * jax.random.normal(keys[9], (1, C), jnp.float32)

    ref = residual_block_ref(x, w1, g1, b1, w2, g2, b2, ws, gs, bs)

    # f32 MXU operands: tight agreement with the f32 reference.
    out_f32 = jax.block_until_ready(
        residual_block(x, w1, g1, b1, w2, g2, b2, ws, gs, bs,
                       matmul_dtype=jnp.float32))
    np.testing.assert_allclose(np.asarray(out_f32), np.asarray(ref),
                               rtol=1e-4, atol=1e-4)

    # Default bf16 MXU operands (f32 accumulation / f32 BN stats): looser check.
    out_bf16 = jax.block_until_ready(
        residual_block(x, w1, g1, b1, w2, g2, b2, ws, gs, bs))
    np.testing.assert_allclose(np.asarray(out_bf16), np.asarray(ref),
                               rtol=1e-1, atol=1e-1)

    print("KERNEL_OK")
</pallas_src>

<mosaic_0001>
module attributes {stable_mosaic.version = 11 : i64} {
  func.func @_residual_block_kernel(%arg0: memref<32x192xf32, #tpu.memory_space<vmem>>, %arg1: memref<192x256xf32, #tpu.memory_space<vmem>>, %arg2: memref<384x128xf32, #tpu.memory_space<vmem>>, %arg3: memref<128x8xf32, #tpu.memory_space<vmem>>, %arg4: memref<8x128xf32, #tpu.memory_space<vmem>>, %arg5: memref<6x8xf32, #tpu.memory_space<vmem>>, %arg6: memref<32x128xf32, #tpu.memory_space<vmem>>) attributes {dimension_semantics = [], scalar_prefetch = 0 : i64, scratch_operands = 0 : i64, tpu.core_type = #tpu.core_type<tc>} {
    %c0 = arith.constant 0 : index
    %c0_0 = arith.constant 0 : index
    %0 = vector.load %arg3[%c0, %c0_0] : memref<128x8xf32, #tpu.memory_space<vmem>>, vector<128x8xf32>
    %c0_1 = arith.constant 0 : index
    %c0_2 = arith.constant 0 : index
    %1 = vector.load %arg4[%c0_1, %c0_2] : memref<8x128xf32, #tpu.memory_space<vmem>>, vector<8x128xf32>
    %c0_3 = arith.constant 0 : index
    %c0_4 = arith.constant 0 : index
    %2 = vector.load %arg5[%c0_3, %c0_4] : memref<6x8xf32, #tpu.memory_space<vmem>>, vector<6x8xf32>
    %c0_5 = arith.constant 0 : index
    %c0_6 = arith.constant 0 : index
    %3 = vector.load %arg0[%c0_5, %c0_6] : memref<32x192xf32, #tpu.memory_space<vmem>>, vector<32x192xf32>
    %c0_7 = arith.constant 0 : index
    %c0_8 = arith.constant 0 : index
    %4 = vector.load %arg1[%c0_7, %c0_8] : memref<192x256xf32, #tpu.memory_space<vmem>>, vector<192x256xf32>
    %cst = arith.constant dense<0.000000e+00> : vector<32x256xf32>
    %5 = tpu.matmul %3, %4, %cst {dimension_numbers = #tpu.dot_dimension_numbers<[1], [0], [0], [1], [0, 0, 1, 1], [], []>} : vector<32x192xf32>, vector<192x256xf32>, vector<32x256xf32> -> vector<32x256xf32>
    %6 = vector.extract_strided_slice %5 {offsets = [0, 0], sizes = [32, 128], strides = [1, 1]} : vector<32x256xf32> to vector<32x128xf32>
    %7 = vector.extract_strided_slice %5 {offsets = [0, 128], sizes = [32, 128], strides = [1, 1]} : vector<32x256xf32> to vector<32x128xf32>
    %8 = vector.extract_strided_slice %2 {offsets = [0, 0], sizes = [1, 8], strides = [1, 1]} : vector<6x8xf32> to vector<1x8xf32>
    %9 = vector.extract_strided_slice %2 {offsets = [1, 0], sizes = [1, 8], strides = [1, 1]} : vector<6x8xf32> to vector<1x8xf32>
    %cst_9 = arith.constant dense<0.000000e+00> : vector<128xf32>
    %10 = vector.multi_reduction <add>, %6, %cst_9 [0] : vector<32x128xf32> to vector<128xf32>
    %11 = vector.shape_cast %10 : vector<128xf32> to vector<1x128xf32>
    %12 = arith.mulf %6, %6 : vector<32x128xf32>
    %cst_10 = arith.constant dense<0.000000e+00> : vector<128xf32>
    %13 = vector.multi_reduction <add>, %12, %cst_10 [0] : vector<32x128xf32> to vector<128xf32>
    %14 = vector.shape_cast %13 : vector<128xf32> to vector<1x128xf32>
    %cst_11 = arith.constant dense<0.000000e+00> : vector<1x8xf32>
    %15 = tpu.matmul %11, %0, %cst_11 {dimension_numbers = #tpu.dot_dimension_numbers<[1], [0], [0], [1], [0, 0, 1, 1], [], []>} : vector<1x128xf32>, vector<128x8xf32>, vector<1x8xf32> -> vector<1x8xf32>
    %cst_12 = arith.constant 0.001953125 : f32
    %16 = vector.broadcast %cst_12 : f32 to vector<1x8xf32>
    %17 = arith.mulf %15, %16 : vector<1x8xf32>
    %cst_13 = arith.constant dense<0.000000e+00> : vector<1x8xf32>
    %18 = tpu.matmul %14, %0, %cst_13 {dimension_numbers = #tpu.dot_dimension_numbers<[1], [0], [0], [1], [0, 0, 1, 1], [], []>} : vector<1x128xf32>, vector<128x8xf32>, vector<1x8xf32> -> vector<1x8xf32>
    %cst_14 = arith.constant 0.001953125 : f32
    %19 = vector.broadcast %cst_14 : f32 to vector<1x8xf32>
    %20 = arith.mulf %18, %19 : vector<1x8xf32>
    %21 = arith.mulf %17, %17 : vector<1x8xf32>
    %22 = arith.subf %20, %21 : vector<1x8xf32>
    %cst_15 = arith.constant 0.000000e+00 : f32
    %23 = vector.broadcast %cst_15 : f32 to vector<1x8xf32>
    %24 = arith.maximumf %22, %23 : vector<1x8xf32>
    %cst_16 = arith.constant 9.99999974E-6 : f32
    %25 = vector.broadcast %cst_16 : f32 to vector<1x8xf32>
    %26 = arith.addf %24, %25 : vector<1x8xf32>
    %27 = math.rsqrt %26 : vector<1x8xf32>
    %28 = arith.mulf %8, %27 : vector<1x8xf32>
    %cst_17 = arith.constant dense<0.000000e+00> : vector<1x128xf32>
    %29 = tpu.matmul %28, %1, %cst_17 {dimension_numbers = #tpu.dot_dimension_numbers<[1], [0], [0], [1], [0, 0, 1, 1], [], []>} : vector<1x8xf32>, vector<8x128xf32>, vector<1x128xf32> -> vector<1x128xf32>
    %30 = arith.mulf %17, %8 : vector<1x8xf32>
    %31 = arith.mulf %30, %27 : vector<1x8xf32>
    %32 = arith.subf %9, %31 : vector<1x8xf32>
    %cst_18 = arith.constant dense<0.000000e+00> : vector<1x128xf32>
    %33 = tpu.matmul %32, %1, %cst_18 {dimension_numbers = #tpu.dot_dimension_numbers<[1], [0], [0], [1], [0, 0, 1, 1], [], []>} : vector<1x8xf32>, vector<8x128xf32>, vector<1x128xf32> -> vector<1x128xf32>
    %34 = vector.broadcast %29 : vector<1x128xf32> to vector<32x128xf32>
    %35 = arith.mulf %6, %34 : vector<32x128xf32>
    %36 = vector.broadcast %33 : vector<1x128xf32> to vector<32x128xf32>
    %37 = arith.addf %35, %36 : vector<32x128xf32>
    %cst_19 = arith.constant 0.000000e+00 : f32
    %38 = vector.broadcast %cst_19 : f32 to vector<32x128xf32>
    %39 = arith.maximumf %37, %38 : vector<32x128xf32>
    %40 = tpu.iota {dimensions = array<i32: 1>} : vector<2x16x128xi32>
    %41 = vector.shape_cast %40 : vector<2x16x128xi32> to vector<32x128xi32>
    %cst_20 = arith.constant 0.000000e+00 : f32
    %42 = vector.broadcast %cst_20 : f32 to vector<1x128xf32>
    %43 = vector.extract_strided_slice %39 {offsets = [0, 0], sizes = [31, 128], strides = [1, 1]} : vector<32x128xf32> to vector<31x128xf32>
    %44 = tpu.concatenate %42, %43 in 0 : vector<1x128xf32>, vector<31x128xf32> -> vector<32x128xf32>
    %45 = vector.extract_strided_slice %39 {offsets = [1, 0], sizes = [31, 128], strides = [1, 1]} : vector<32x128xf32> to vector<31x128xf32>
    %46 = tpu.concatenate %45, %42 in 0 : vector<31x128xf32>, vector<1x128xf32> -> vector<32x128xf32>
    %c1_i32 = arith.constant 1 : i32
    %47 = vector.broadcast %c1_i32 : i32 to vector<32x128xi32>
    %48 = arith.cmpi sge, %41, %47 : vector<32x128xi32>
    %cst_21 = arith.constant 0.000000e+00 : f32
    %49 = vector.broadcast %cst_21 : f32 to vector<32x128xf32>
    %50 = arith.select %48, %44, %49 : vector<32x128xi1>, vector<32x128xf32>
    %c14_i32 = arith.constant 14 : i32
    %51 = vector.broadcast %c14_i32 : i32 to vector<32x128xi32>
    %52 = arith.cmpi sle, %41, %51 : vector<32x128xi32>
    %cst_22 = arith.constant 0.000000e+00 : f32
    %53 = vector.broadcast %cst_22 : f32 to vector<32x128xf32>
    %54 = arith.select %52, %46, %53 : vector<32x128xi1>, vector<32x128xf32>
    %55 = tpu.concatenate %50, %39, %54 in 1 : vector<32x128xf32>, vector<32x128xf32>, vector<32x128xf32> -> vector<32x384xf32>
    %c0_23 = arith.constant 0 : index
    %c0_24 = arith.constant 0 : index
    %56 = vector.load %arg2[%c0_23, %c0_24] : memref<384x128xf32, #tpu.memory_space<vmem>>, vector<384x128xf32>
    %cst_25 = arith.constant dense<0.000000e+00> : vector<32x128xf32>
    %57 = tpu.matmul %55, %56, %cst_25 {dimension_numbers = #tpu.dot_dimension_numbers<[1], [0], [0], [1], [0, 0, 1, 1], [], []>} : vector<32x384xf32>, vector<384x128xf32>, vector<32x128xf32> -> vector<32x128xf32>
    %58 = vector.extract_strided_slice %2 {offsets = [2, 0], sizes = [1, 8], strides = [1, 1]} : vector<6x8xf32> to vector<1x8xf32>
    %59 = vector.extract_strided_slice %2 {offsets = [3, 0], sizes = [1, 8], strides = [1, 1]} : vector<6x8xf32> to vector<1x8xf32>
    %cst_26 = arith.constant dense<0.000000e+00> : vector<128xf32>
    %60 = vector.multi_reduction <add>, %57, %cst_26 [0] : vector<32x128xf32> to vector<128xf32>
    %61 = vector.shape_cast %60 : vector<128xf32> to vector<1x128xf32>
    %62 = arith.mulf %57, %57 : vector<32x128xf32>
    %cst_27 = arith.constant dense<0.000000e+00> : vector<128xf32>
    %63 = vector.multi_reduction <add>, %62, %cst_27 [0] : vector<32x128xf32> to vector<128xf32>
    %64 = vector.shape_cast %63 : vector<128xf32> to vector<1x128xf32>
    %cst_28 = arith.constant dense<0.000000e+00> : vector<1x8xf32>
    %65 = tpu.matmul %61, %0, %cst_28 {dimension_numbers = #tpu.dot_dimension_numbers<[1], [0], [0], [1], [0, 0, 1, 1], [], []>} : vector<1x128xf32>, vector<128x8xf32>, vector<1x8xf32> -> vector<1x8xf32>
    %cst_29 = arith.constant 0.001953125 : f32
    %66 = vector.broadcast %cst_29 : f32 to vector<1x8xf32>
    %67 = arith.mulf %65, %66 : vector<1x8xf32>
    %cst_30 = arith.constant dense<0.000000e+00> : vector<1x8xf32>
    %68 = tpu.matmul %64, %0, %cst_30 {dimension_numbers = #tpu.dot_dimension_numbers<[1], [0], [0], [1], [0, 0, 1, 1], [], []>} : vector<1x128xf32>, vector<128x8xf32>, vector<1x8xf32> -> vector<1x8xf32>
    %cst_31 = arith.constant 0.001953125 : f32
    %69 = vector.broadcast %cst_31 : f32 to vector<1x8xf32>
    %70 = arith.mulf %68, %69 : vector<1x8xf32>
    %71 = arith.mulf %67, %67 : vector<1x8xf32>
    %72 = arith.subf %70, %71 : vector<1x8xf32>
    %cst_32 = arith.constant 0.000000e+00 : f32
    %73 = vector.broadcast %cst_32 : f32 to vector<1x8xf32>
    %74 = arith.maximumf %72, %73 : vector<1x8xf32>
    %cst_33 = arith.constant 9.99999974E-6 : f32
    %75 = vector.broadcast %cst_33 : f32 to vector<1x8xf32>
    %76 = arith.addf %74, %75 : vector<1x8xf32>
    %77 = math.rsqrt %76 : vector<1x8xf32>
    %78 = arith.mulf %58, %77 : vector<1x8xf32>
    %cst_34 = arith.constant dense<0.000000e+00> : vector<1x128xf32>
    %79 = tpu.matmul %78, %1, %cst_34 {dimension_numbers = #tpu.dot_dimension_numbers<[1], [0], [0], [1], [0, 0, 1, 1], [], []>} : vector<1x8xf32>, vector<8x128xf32>, vector<1x128xf32> -> vector<1x128xf32>
    %80 = arith.mulf %67, %58 : vector<1x8xf32>
    %81 = arith.mulf %80, %77 : vector<1x8xf32>
    %82 = arith.subf %59, %81 : vector<1x8xf32>
    %cst_35 = arith.constant dense<0.000000e+00> : vector<1x128xf32>
    %83 = tpu.matmul %82, %1, %cst_35 {dimension_numbers = #tpu.dot_dimension_numbers<[1], [0], [0], [1], [0, 0, 1, 1], [], []>} : vector<1x8xf32>, vector<8x128xf32>, vector<1x128xf32> -> vector<1x128xf32>
    %84 = vector.broadcast %79 : vector<1x128xf32> to vector<32x128xf32>
    %85 = arith.mulf %57, %84 : vector<32x128xf32>
    %86 = vector.broadcast %83 : vector<1x128xf32> to vector<32x128xf32>
    %87 = arith.addf %85, %86 : vector<32x128xf32>
    %cst_36 = arith.constant 0.000000e+00 : f32
    %88 = vector.broadcast %cst_36 : f32 to vector<32x128xf32>
    %89 = arith.maximumf %87, %88 : vector<32x128xf32>
    %90 = vector.extract_strided_slice %2 {offsets = [4, 0], sizes = [1, 8], strides = [1, 1]} : vector<6x8xf32> to vector<1x8xf32>
    %91 = vector.extract_strided_slice %2 {offsets = [5, 0], sizes = [1, 8], strides = [1, 1]} : vector<6x8xf32> to vector<1x8xf32>
    %cst_37 = arith.constant dense<0.000000e+00> : vector<128xf32>
    %92 = vector.multi_reduction <add>, %7, %cst_37 [0] : vector<32x128xf32> to vector<128xf32>
    %93 = vector.shape_cast %92 : vector<128xf32> to vector<1x128xf32>
    %94 = arith.mulf %7, %7 : vector<32x128xf32>
    %cst_38 = arith.constant dense<0.000000e+00> : vector<128xf32>
    %95 = vector.multi_reduction <add>, %94, %cst_38 [0] : vector<32x128xf32> to vector<128xf32>
    %96 = vector.shape_cast %95 : vector<128xf32> to vector<1x128xf32>
    %cst_39 = arith.constant dense<0.000000e+00> : vector<1x8xf32>
    %97 = tpu.matmul %93, %0, %cst_39 {dimension_numbers = #tpu.dot_dimension_numbers<[1], [0], [0], [1], [0, 0, 1, 1], [], []>} : vector<1x128xf32>, vector<128x8xf32>, vector<1x8xf32> -> vector<1x8xf32>
    %cst_40 = arith.constant 0.001953125 : f32
    %98 = vector.broadcast %cst_40 : f32 to vector<1x8xf32>
    %99 = arith.mulf %97, %98 : vector<1x8xf32>
    %cst_41 = arith.constant dense<0.000000e+00> : vector<1x8xf32>
    %100 = tpu.matmul %96, %0, %cst_41 {dimension_numbers = #tpu.dot_dimension_numbers<[1], [0], [0], [1], [0, 0, 1, 1], [], []>} : vector<1x128xf32>, vector<128x8xf32>, vector<1x8xf32> -> vector<1x8xf32>
    %cst_42 = arith.constant 0.001953125 : f32
    %101 = vector.broadcast %cst_42 : f32 to vector<1x8xf32>
    %102 = arith.mulf %100, %101 : vector<1x8xf32>
    %103 = arith.mulf %99, %99 : vector<1x8xf32>
    %104 = arith.subf %102, %103 : vector<1x8xf32>
    %cst_43 = arith.constant 0.000000e+00 : f32
    %105 = vector.broadcast %cst_43 : f32 to vector<1x8xf32>
    %106 = arith.maximumf %104, %105 : vector<1x8xf32>
    %cst_44 = arith.constant 9.99999974E-6 : f32
    %107 = vector.broadcast %cst_44 : f32 to vector<1x8xf32>
    %108 = arith.addf %106, %107 : vector<1x8xf32>
    %109 = math.rsqrt %108 : vector<1x8xf32>
    %110 = arith.mulf %90, %109 : vector<1x8xf32>
    %cst_45 = arith.constant dense<0.000000e+00> : vector<1x128xf32>
    %111 = tpu.matmul %110, %1, %cst_45 {dimension_numbers = #tpu.dot_dimension_numbers<[1], [0], [0], [1], [0, 0, 1, 1], [], []>} : vector<1x8xf32>, vector<8x128xf32>, vector<1x128xf32> -> vector<1x128xf32>
    %112 = arith.mulf %99, %90 : vector<1x8xf32>
    %113 = arith.mulf %112, %109 : vector<1x8xf32>
    %114 = arith.subf %91, %113 : vector<1x8xf32>
    %cst_46 = arith.constant dense<0.000000e+00> : vector<1x128xf32>
    %115 = tpu.matmul %114, %1, %cst_46 {dimension_numbers = #tpu.dot_dimension_numbers<[1], [0], [0], [1], [0, 0, 1, 1], [], []>} : vector<1x8xf32>, vector<8x128xf32>, vector<1x128xf32> -> vector<1x128xf32>
    %116 = vector.broadcast %111 : vector<1x128xf32> to vector<32x128xf32>
    %117 = arith.mulf %7, %116 : vector<32x128xf32>
    %118 = vector.broadcast %115 : vector<1x128xf32> to vector<32x128xf32>
    %119 = arith.addf %117, %118 : vector<32x128xf32>
    %120 = arith.addf %89, %119 : vector<32x128xf32>
    %c0_47 = arith.constant 0 : index
    %c0_48 = arith.constant 0 : index
    %121 = vector.load %arg6[%c0_47, %c0_48] : memref<32x128xf32, #tpu.memory_space<vmem>>, vector<32x128xf32>
    tpu.vector_store %arg6[%c0_47, %c0_48], %120 {strides = array<i32>} : memref<32x128xf32, #tpu.memory_space<vmem>>, vector<32x128xf32>,
    return
  }
}

</mosaic_0001>

<bundles_post_ra>
// kernel: residual_block.1
= control target key start
LH: loop header
LB: loop body
LE: loop exit
PB: predicated region body
PF: predicated region fallthrough
CT: control target
= control target key end

     0   :  { %v2248_v3 = vmov 0.0|0.0   ;;  %vm97_vm0 = vcmask 523264   ;;  %vm2249_vm1 = vmmov 0   ;;  %vm369_vm2 = vcmask 64512   ;;  %s2935_s1 = inlined_call_operand.vmem [shape: f32[192,256], index: 1, kind: input, shape index: {}]   ;;  %s2936_s0 = inlined_call_operand.vmem [shape: f32[32,192], index: 0, kind: input, shape index: {}]   ;;  %s2937_s3 = inlined_call_operand.vmem [shape: f32[128,8], index: 3, kind: input, shape index: {}]   ;;  %s2938_s4 = inlined_call_operand.vmem [shape: f32[8,128], index: 4, kind: input, shape index: {}]   ;;  %s2939_s2 = inlined_call_operand.vmem [shape: f32[384,128], index: 2, kind: input, shape index: {}]   ;;  %s2940_s5 = inlined_call_operand.vmem [shape: f32[6,8], index: 5, kind: input, shape index: {}]   ;;  %s2941_s6 = inlined_call_operand.vmem [shape: f32[32,128], index: 6, kind: output, shape index: {}]  }
   0x1   :  { %v50_v0 = vld [vmem:[%s2935_s1 + $0x8] sm:$0xff]  ;;  %v52_v1 = vld [vmem:[%s2935_s1 + $0x18] sm:$0xff]  ;;  %v49_v2 = vld [vmem:[%s2935_s1] sm:$0xff]  ;;  %2031 = vmatprep.subr.bf16.mxu1 %v2248_v3  ;;  %vm550_vm3 = vcmask 1040384   ;;  %vm563_vm5 = vcmask 1046528  }
   0x2   :  { %v1983_v4 = vpack.c.bf16 %v52_v1, %v50_v0  ;;  %v51_v5 = vld [vmem:[%s2935_s1 + $0x10] sm:$0xff]  ;;  %v54_v6 = vld [vmem:[%s2935_s1 + $0x28] sm:$0xff]  ;;  %v56_v7 = vld [vmem:[%s2935_s1 + $0x38] sm:$0xff] }
   0x3   :  { %v1985_v8 = vpack.c.bf16 %v51_v5, %v49_v2  ;;  %v1987_v9 = vpack.c.bf16 %v56_v7, %v54_v6  ;;  %v53_v10 = vld [vmem:[%s2935_s1 + $0x20] sm:$0xff]  ;;  %v55_v11 = vld [vmem:[%s2935_s1 + $0x30] sm:$0xff]  ;;  %v58_v12 = vld [vmem:[%s2935_s1 + $0x48] sm:$0xff] }
   0x4   :  { %1984 = vmatprep.subr.bf16.mxu0 %v1983_v4  ;;  %v60_v13 = vld [vmem:[%s2935_s1 + $0x58] sm:$0xff]  ;;  %v1989_v14 = vpack.c.bf16 %v55_v11, %v53_v10  ;;  %v57_v16 = vld [vmem:[%s2935_s1 + $0x40] sm:$0xff]  ;;  %v59_v17 = vld [vmem:[%s2935_s1 + $0x50] sm:$0xff] }
   0x5   :  { %1986 = vmatpush1.bf16.msra.mxu0 %v1985_v8  ;;  %v1991_v15 = vpack.c.bf16 %v60_v13, %v58_v12  ;;  %v62_v18 = vld [vmem:[%s2935_s1 + $0x68] sm:$0xff]  ;;  %v64_v19 = vld [vmem:[%s2935_s1 + $0x78] sm:$0xff]  ;;  %v1993_v20 = vpack.c.bf16 %v59_v17, %v57_v16  ;;  %v61_v22 = vld [vmem:[%s2935_s1 + $0x60] sm:$0xff] }
   0x6   :  { %1988 = vmatprep.subr.bf16.mxu0 %v1987_v9  ;;  %v1995_v21 = vpack.c.bf16 %v64_v19, %v62_v18  ;;  %v63_v23 = vld [vmem:[%s2935_s1 + $0x70] sm:$0xff]  ;;  %v66_v24 = vld [vmem:[%s2935_s1 + $0x88] sm:$0xff]  ;;  %v68_v25 = vld [vmem:[%s2935_s1 + $0x98] sm:$0xff] }
   0x7   :  { %v1997_v26 = vpack.c.bf16 %v63_v23, %v61_v22  ;;  %v1999_v27 = vpack.c.bf16 %v68_v25, %v66_v24  ;;  %v65_v28 = vld [vmem:[%s2935_s1 + $0x80] sm:$0xff]  ;;  %v67_v29 = vld [vmem:[%s2935_s1 + $0x90] sm:$0xff]  ;;  %v70_v30 = vld [vmem:[%s2935_s1 + $0xa8] sm:$0xff] }
   0x8   :  { %v72_v31 = vld [vmem:[%s2935_s1 + $0xb8] sm:$0xff]  ;;  %v2001_v32 = vpack.c.bf16 %v67_v29, %v65_v28  ;;  %v42_v33 = vld [vmem:[%s2936_s0 + $0x8] sm:$0xff]  ;;  %v69_v35 = vld [vmem:[%s2935_s1 + $0xa0] sm:$0xff] }
   0x9   :  { %1990 = vmatpush1.bf16.msra.mxu0 %v1989_v14  ;;  %v2003_v34 = vpack.c.bf16 %v72_v31, %v70_v30  ;;  %v71_v36 = vld [vmem:[%s2935_s1 + $0xb0] sm:$0xff]  ;;  %1513 = vmatprep.mubr.msk.f32.mxu0 %vm97_vm0, %v42_v33  ;;  %v74_v37 = vld [vmem:[%s2935_s1 + $0xc8] sm:$0xff]  ;;  %v76_v38 = vld [vmem:[%s2935_s1 + $0xd8] sm:$0xff] }
   0xa   :  { %1992 = vmatprep.subr.bf16.mxu0 %v1991_v15  ;;  %v23_v39 = vld [vmem:[%s2937_s3] sm:$0xff]  ;;  %v24_v40 = vld [vmem:[%s2937_s3 + $0x8] sm:$0xff]  ;;  %v25_v41 = vld [vmem:[%s2937_s3 + $0x10] sm:$0xff]  ;;  %v2005_v43 = vpack.c.bf16 %v71_v36, %v69_v35  ;;  %v2007_v45 = vpack.c.bf16 %v76_v38, %v74_v37 }
   0xb   :  { %v26_v42 = vld [vmem:[%s2937_s3 + $0x18] sm:$0xff]  ;;  %v2381_v44 = vpack.c.bf16 %v24_v40, %v23_v39  ;;  %v73_v46 = vld [vmem:[%s2935_s1 + $0xc0] sm:$0xff]  ;;  %v75_v47 = vld [vmem:[%s2935_s1 + $0xd0] sm:$0xff] }
   0xc   :  { %v78_v48 = vld [vmem:[%s2935_s1 + $0xe8] sm:$0xff]  ;;  %v80_v49 = vld [vmem:[%s2935_s1 + $0xf8] sm:$0xff]  ;;  %v2396_v50 = vpack.c.bf16 %v26_v42, %v25_v41  ;;  %v2009_v51 = vpack.c.bf16 %v75_v47, %v73_v46  ;;  %v77_v53 = vld [vmem:[%s2935_s1 + $0xe0] sm:$0xff]  ;;  %v2250_v42 = vmov 0.0  }
   0xd   :  { %1994 = vmatpush1.bf16.msra.mxu0 %v1993_v20  ;;  %2033 = vmatpush3.bf16.msra.mxu1 %v2381_v44  ;;  %v2011_v52 = vpack.c.bf16 %v80_v49, %v78_v48  ;;  %v79_v54 = vld [vmem:[%s2935_s1 + $0xf0] sm:$0xff]  ;;  %v82_v55 = vld [vmem:[%s2935_s1 + $0x108] sm:$0xff]  ;;  %v84_v56 = vld [vmem:[%s2935_s1 + $0x118] sm:$0xff] }
   0xe   :  { %1996 = vmatprep.subr.bf16.mxu0 %v1995_v21  ;;  %2034 = vmatprep.subr.bf16.mxu1 %v2248_v3  ;;  %v2013_v57 = vpack.c.bf16 %v79_v54, %v77_v53  ;;  %v2015_v58 = vpack.c.bf16 %v84_v56, %v82_v55  ;;  %v81_v59 = vld [vmem:[%s2935_s1 + $0x100] sm:$0xff]  ;;  %v83_v60 = vld [vmem:[%s2935_s1 + $0x110] sm:$0xff]  ;;  %v86_v61 = vld [vmem:[%s2935_s1 + $0x128] sm:$0xff] }
   0xf   :  { %v88_v62 = vld [vmem:[%s2935_s1 + $0x138] sm:$0xff]  ;;  %v2017_v63 = vpack.c.bf16 %v83_v60, %v81_v59  ;;  %v85_v1 = vld [vmem:[%s2935_s1 + $0x120] sm:$0xff]  ;;  %v87_v2 = vld [vmem:[%s2935_s1 + $0x130] sm:$0xff]  ;;  %1737 = vmatprep.mubr.msk.f32.mxu1 %vm2249_vm1, %v2250_v42 }
  0x10   :  { %v2019_v0 = vpack.c.bf16 %v88_v62, %v86_v61  ;;  %v90_v4 = vld [vmem:[%s2935_s1 + $0x148] sm:$0xff]  ;;  %v92_v5 = vld [vmem:[%s2935_s1 + $0x158] sm:$0xff]  ;;  %v2021_v6 = vpack.c.bf16 %v87_v2, %v85_v1  ;;  %v89_v8 = vld [vmem:[%s2935_s1 + $0x140] sm:$0xff] }
  0x11   :  { %1998 = vmatpush1.bf16.msra.mxu0 %v1997_v26  ;;  %2036 = vmatpush3.bf16.msra.mxu1 %v2396_v50  ;;  %v2023_v7 = vpack.c.bf16 %v92_v5, %v90_v4  ;;  %v91_v9 = vld [vmem:[%s2935_s1 + $0x150] sm:$0xff]  ;;  %v94_v10 = vld [vmem:[%s2935_s1 + $0x168] sm:$0xff]  ;;  %v96_v11 = vld [vmem:[%s2935_s1 + $0x178] sm:$0xff] }
  0x12   :  { %2000 = vmatprep.subr.bf16.mxu0 %v1999_v27  ;;  %2037 = vmatprep.subr.bf16.mxu1 %v2248_v3  ;;  %v2025_v12 = vpack.c.bf16 %v91_v9, %v89_v8  ;;  %v2027_v13 = vpack.c.bf16 %v96_v11, %v94_v10  ;;  %v93_v14 = vld [vmem:[%s2935_s1 + $0x160] sm:$0xff]  ;;  %v95_v15 = vld [vmem:[%s2935_s1 + $0x170] sm:$0xff]  ;;  %v44_v18 = vld [vmem:[%s2936_s0 + $0x18] sm:$0xff] }
  0x13   :  { %v2029_v16 = vpack.c.bf16 %v95_v15, %v93_v14  ;;  %v41_v17 = vld [vmem:[%s2936_s0] sm:$0xff]  ;;  %v43_v19 = vld [vmem:[%s2936_s0 + $0x10] sm:$0xff]  ;;  %v46_v20 = vld [vmem:[%s2936_s0 + $0x28] sm:$0xff] }
  0x14   :  { %v45_v21 = vld [vmem:[%s2936_s0 + $0x20] sm:$0xff]  ;;  %v48_v22 = vld [vmem:[%s2936_s0 + $0x38] sm:$0xff]  ;;  %v47_v23 = vld [vmem:[%s2936_s0 + $0x30] sm:$0xff] }
  0x15   :  { %2002 = vmatpush1.bf16.msra.mxu0 %v2001_v32  ;;  %v27_v24 = vld [vmem:[%s2937_s3 + $0x20] sm:$0xff]  ;;  %v28_v25 = vld [vmem:[%s2937_s3 + $0x28] sm:$0xff]  ;;  %v29_v27 = vld [vmem:[%s2937_s3 + $0x30] sm:$0xff] }
  0x16   :  { %2004 = vmatprep.subr.bf16.mxu0 %v2003_v34  ;;  %v2485_v26 = vpack.c.bf16 %v28_v25, %v27_v24  ;;  %v30_v28 = vld [vmem:[%s2937_s3 + $0x38] sm:$0xff]  ;;  %v31_v30 = vld [vmem:[%s2937_s3 + $0x40] sm:$0xff]  ;;  %v32_v31 = vld [vmem:[%s2937_s3 + $0x48] sm:$0xff] }
  0x17   :  { %v2495_v29 = vpack.c.bf16 %v30_v28, %v29_v27  ;;  %v2505_v32 = vpack.c.bf16 %v32_v31, %v31_v30  ;;  %v33_v33 = vld [vmem:[%s2937_s3 + $0x50] sm:$0xff]  ;;  %v34_v34 = vld [vmem:[%s2937_s3 + $0x58] sm:$0xff]  ;;  %v35_v36 = vld [vmem:[%s2937_s3 + $0x60] sm:$0xff] }
  0x18   :  { %2039 = vmatpush3.bf16.msra.mxu1 %v2485_v26  ;;  %v2515_v35 = vpack.c.bf16 %v34_v34, %v33_v33  ;;  %v36_v37 = vld [vmem:[%s2937_s3 + $0x68] sm:$0xff]  ;;  %v37_v39 = vld [vmem:[%s2937_s3 + $0x70] sm:$0xff]  ;;  %v38_v40 = vld [vmem:[%s2937_s3 + $0x78] sm:$0xff] }
  0x19   :  { %2006 = vmatpush1.bf16.msra.mxu0 %v2005_v43  ;;  %2040 = vmatprep.subr.bf16.mxu1 %v2248_v3  ;;  %v2525_v38 = vpack.c.bf16 %v36_v37, %v35_v36  ;;  %v2535_v41 = vpack.c.bf16 %v38_v40, %v37_v39  ;;  %v605_v24 = vld [vmem:[%s2939_s2 + $0x88] sm:$0xff]  ;;  %v588_v25 = vld [vmem:[%s2939_s2] sm:$0xff]  ;;  %v606_v31 = vld [vmem:[%s2939_s2 + $0x90] sm:$0xff] }
  0x1a   :  { %2008 = vmatprep.subr.bf16.mxu0 %v2007_v45  ;;  %v589_v28 = vld [vmem:[%s2939_s2 + $0x8] sm:$0xff]  ;;  %v607_v33 = vld [vmem:[%s2939_s2 + $0x98] sm:$0xff]  ;;  %v590_v34 = vld [vmem:[%s2939_s2 + $0x10] sm:$0xff] }
  0x1b   :  { %v2081_v30 = vpack.c.bf16 %v589_v28, %v588_v25  ;;  %v2083_v36 = vpack.c.bf16 %v607_v33, %v606_v31  ;;  %v591_v37 = vld [vmem:[%s2939_s2 + $0x18] sm:$0xff]  ;;  %v608_v40 = vld [vmem:[%s2939_s2 + $0xa0] sm:$0xff]  ;;  %v625_v31 = vld [vmem:[%s2939_s2 + $0x128] sm:$0xff] }
  0x1c   :  { %2042 = vmatpush3.bf16.msra.mxu1 %v2495_v29  ;;  %v2085_v39 = vpack.c.bf16 %v591_v37, %v590_v34  ;;  %v626_v34 = vld [vmem:[%s2939_s2 + $0x130] sm:$0xff] }
  0x1d   :  { %2010 = vmatpush1.bf16.msra.mxu0 %v2009_v51  ;;  %2043 = vmatprep.subr.bf16.mxu1 %v2248_v3 }
  0x1e   :  { %2012 = vmatprep.subr.bf16.mxu0 %v2011_v52 }
  0x20   :  { %2045 = vmatpush3.bf16.msra.mxu1 %v2505_v32 }
  0x21   :  { %2014 = vmatpush1.bf16.msra.mxu0 %v2013_v57  ;;  %2046 = vmatprep.subr.bf16.mxu1 %v2248_v3 }
  0x22   :  { %2016 = vmatprep.subr.bf16.mxu0 %v2015_v58 }
  0x24   :  { %2048 = vmatpush3.bf16.msra.mxu1 %v2515_v35 }
  0x25   :  { %2018 = vmatpush1.bf16.msra.mxu0 %v2017_v63  ;;  %2049 = vmatprep.subr.bf16.mxu1 %v2248_v3 }
  0x26   :  { %2020 = vmatprep.subr.bf16.mxu0 %v2019_v0 }
  0x28   :  { %2051 = vmatpush3.bf16.msra.mxu1 %v2525_v38 }
  0x29   :  { %2022 = vmatpush1.bf16.msra.mxu0 %v2021_v6  ;;  %2052 = vmatprep.subr.bf16.mxu1 %v2248_v3 }
  0x2a   :  { %2024 = vmatprep.subr.bf16.mxu0 %v2023_v7 }
  0x2c   :  { %2054 = vmatpush3.bf16.msra.mxu1 %v2535_v41 }
  0x2d   :  { %2026 = vmatpush1.bf16.msra.mxu0 %v2025_v12  ;;  %2055 = vmatprep.subr.bf16.mxu1 %v2248_v3 }
  0x2e   :  { %2028 = vmatprep.subr.bf16.mxu0 %v2027_v13 }
  0x31   :  { %2030 = vmatpush1.bf16.msra.mxu0 %v2029_v16 }
  0x32   :  { %1775 = vmatprep.subr.mxu0 %v2250_v42 }
  0x34   :  { %175 = vmatmul.mubr.f32.vlgmr.msra.gmra.mrb[0].mxu0 %v41_v17 }
  0x35   :  { %1514 = vmatprep.mubr.msk.f32.mxu0 %vm97_vm0, %v44_v18 }
  0x38   :  { %181 = vmatmul.mubr.f32.gmra.mrb[2].mxu0 %v43_v19 }
  0x39   :  { %1515 = vmatprep.mubr.msk.f32.mxu0 %vm97_vm0, %v46_v20 }
  0x3c   :  { %187 = vmatmul.mubr.f32.gmra.mrb[4].mxu0 %v45_v21 }
  0x3d   :  { %1516 = vmatprep.mubr.msk.f32.mxu0 %vm97_vm0, %v48_v22  ;;  %v2608_v22 = vld [vmem:[%s2938_s4] sm:$0xff] }
  0x3e   :  { %1776 = vmatpush3.msra.mxu0 %v2608_v22 }
  0x3f   :  { %1780 = vmatprep.subr.mxu0 %v2250_v42 }
  0x40   :  { %193 = vmatmul.mubr.f32.gmra.mrb[6].mxu0 %v47_v23  ;;  %v604_v23 = vld [vmem:[%s2939_s2 + $0x80] sm:$0xff] }
  0x41   :  { %1777 = vmatprep.mubr.msk.f32.mxu0 %vm2249_vm1, %v2250_v42  ;;  %v2079_v27 = vpack.c.bf16 %v605_v24, %v604_v23  ;;  %v622_v23 = vld [vmem:[%s2939_s2 + $0x110] sm:$0xff]  ;;  %v623_v24 = vld [vmem:[%s2939_s2 + $0x118] sm:$0xff] }
  0x42   :  { %v2115_v28 = vpack.c.bf16 %v623_v24, %v622_v23  ;;  %v603_v23 = vld [vmem:[%s2939_s2 + $0x78] sm:$0xff]  ;;  %v634_v24 = vld [vmem:[%s2939_s2 + $0x170] sm:$0xff] }
 0x107   :  { %v2544_v43 = vpop.f32.mrb[0].mxu0 }
 0x108   :  { %v2546_v45 = vpop.f32.mrb[1].mxu0  ;;  %v208_v47 = vmul.f32 %v2544_v43, %v2544_v43 }
 0x109   :  { %v1165_v52 = vmul.f32 %v2546_v45, %v2546_v45 }
 0x10b   :  { %v2548_v46 = vpop.f32.mrb[2].mxu0 }
 0x10c   :  { %v199_v48 = vadd.f32 %v2548_v46, %v2544_v43  ;;  %v209_v49 = vmul.f32 %v2548_v46, %v2548_v46  ;;  %v2556_v51 = vpop.f32.mrb[3].mxu0 }
 0x10d   :  { %v1156_v53 = vadd.f32 %v2556_v51, %v2546_v45  ;;  %v1166_v54 = vmul.f32 %v2556_v51, %v2556_v51 }
 0x10e   :  { %v212_v55 = vadd.f32 %v209_v49, %v208_v47  ;;  %v609_v47 = vld [vmem:[%s2939_s2 + $0xa8] sm:$0xff]  ;;  %v592_v49 = vld [vmem:[%s2939_s2 + $0x20] sm:$0xff] }
 0x10f   :  { %v1169_v56 = vadd.f32 %v1166_v54, %v1165_v52  ;;  %v2564_v57 = vpop.f32.mrb[4].mxu0  ;;  %v593_v52 = vld [vmem:[%s2939_s2 + $0x28] sm:$0xff]  ;;  %v610_v54 = vld [vmem:[%s2939_s2 + $0xb0] sm:$0xff] }
 0x110   :  { %v200_v58 = vadd.f32 %v199_v48, %v2564_v57  ;;  %v210_v59 = vmul.f32 %v2564_v57, %v2564_v57  ;;  %v2569_v60 = vpop.f32.mrb[5].mxu0  ;;  %v2087_v48 = vpack.c.bf16 %v609_v47, %v608_v40  ;;  %v613_v40 = vld [vmem:[%s2939_s2 + $0xc8] sm:$0xff] }
 0x111   :  { %v1157_v61 = vadd.f32 %v1156_v53, %v2569_v60  ;;  %v1167_v62 = vmul.f32 %v2569_v60, %v2569_v60  ;;  %v2089_v53 = vpack.c.bf16 %v593_v52, %v592_v49  ;;  %v597_v49 = vld [vmem:[%s2939_s2 + $0x48] sm:$0xff]  ;;  %v628_v52 = vld [vmem:[%s2939_s2 + $0x140] sm:$0xff] }
 0x112   :  { %v213_v63 = vadd.f32 %v212_v55, %v210_v59  ;;  %v611_v55 = vld [vmem:[%s2939_s2 + $0xb8] sm:$0xff] }
 0x113   :  { %v1170_v0 = vadd.f32 %v1169_v56, %v1167_v62  ;;  %v2574_v1 = vpop.f32.mrb[6].mxu0  ;;  %v2091_v56 = vpack.c.bf16 %v611_v55, %v610_v54  ;;  %v595_v59 = vld [vmem:[%s2939_s2 + $0x38] sm:$0xff]  ;;  %v629_v54 = vld [vmem:[%s2939_s2 + $0x148] sm:$0xff] }
 0x114   :  { %v201_v2 = vadd.f32 %v200_v58, %v2574_v1  ;;  %v211_v4 = vmul.f32 %v2574_v1, %v2574_v1  ;;  %v2579_v5 = vpop.f32.mrb[7].mxu0  ;;  %v594_v58 = vld [vmem:[%s2939_s2 + $0x30] sm:$0xff]  ;;  %v2127_v55 = vpack.c.bf16 %v629_v54, %v628_v52 }
 0x115   :  { %v2582_v6 = vadd.f32 %v1157_v61, %v2579_v5  ;;  %v1168_v7 = vmul.f32 %v2579_v5, %v2579_v5  ;;  %v2093_v61 = vpack.c.bf16 %v595_v59, %v594_v58  ;;  %v615_v58 = vld [vmem:[%s2939_s2 + $0xd8] sm:$0xff] }
 0x116   :  { %v202_v8 = vrot.slane %v201_v2, 4  ;;  %v214_v9 = vadd.f32 %v213_v63, %v211_v4 }
 0x117   :  { %v2586_v10 = vadd.f32 %v1170_v0, %v1168_v7 }
 0x118   :  { %v203_v11 = vadd.f32 %v202_v8, %v201_v2  ;;  %v215_v16 = vrot.slane %v214_v9, 4 }
 0x11a   :  { %v204_v12 = vrot.slane %v203_v11, 2  ;;  %v216_v17 = vadd.f32 %v215_v16, %v214_v9 }
 0x11c   :  { %v205_v13 = vadd.f32 %v204_v12, %v203_v11  ;;  %v217_v18 = vrot.slane %v216_v17, 2 }
 0x11e   :  { %v206_v14 = vrot.slane %v205_v13, 1  ;;  %v218_v19 = vadd.f32 %v217_v18, %v216_v17 }
 0x120   :  { %v207_v15 = vadd.f32 %v206_v14, %v205_v13  ;;  %v219_v20 = vrot.slane %v218_v19, 1  ;;  %v2663_v13 = vld [vmem:[%s2940_s5] sm:$0x3f] }
 0x121   :  { %v620_v14 = vld [vmem:[%s2939_s2 + $0x100] sm:$0xff] }
 0x122   :  { %1738 = vmatmul.mubr.f32.vlgmr.msra.gmra.mrb[0].mxu1 %v207_v15  ;;  %v220_v21 = vadd.f32 %v219_v20, %v218_v19  ;;  %v621_v15 = vld [vmem:[%s2939_s2 + $0x108] sm:$0xff] }
 0x123   :  { %2057 = vmatpush3.bf16.msra.mxu1 %v2381_v44  ;;  %1772 = vmatprep.mubr.msk.f32.mxu1 %vm2249_vm1, %v2250_v42  ;;  %v2111_v20 = vpack.c.bf16 %v621_v15, %v620_v14  ;;  %v632_v14 = vld [vmem:[%s2939_s2 + $0x160] sm:$0xff] }
 0x124   :  { %2058 = vmatprep.subr.bf16.mxu1 %v2248_v3 }
 0x127   :  { %2060 = vmatpush3.bf16.msra.mxu1 %v2396_v50 }
 0x128   :  { %2061 = vmatprep.subr.bf16.mxu1 %v2248_v3 }
 0x12b   :  { %2063 = vmatpush3.bf16.msra.mxu1 %v2485_v26 }
 0x12c   :  { %2064 = vmatprep.subr.bf16.mxu1 %v2248_v3 }
 0x12f   :  { %2066 = vmatpush3.bf16.msra.mxu1 %v2495_v29 }
 0x130   :  { %2067 = vmatprep.subr.bf16.mxu1 %v2248_v3 }
 0x133   :  { %2069 = vmatpush3.bf16.msra.mxu1 %v2505_v32 }
 0x134   :  { %2070 = vmatprep.subr.bf16.mxu1 %v2248_v3 }
 0x137   :  { %2072 = vmatpush3.bf16.msra.mxu1 %v2515_v35 }
 0x138   :  { %2073 = vmatprep.subr.bf16.mxu1 %v2248_v3 }
 0x13b   :  { %2075 = vmatpush3.bf16.msra.mxu1 %v2525_v38 }
 0x13c   :  { %2076 = vmatprep.subr.bf16.mxu1 %v2248_v3 }
 0x13f   :  { %2078 = vmatpush3.bf16.msra.mxu1 %v2535_v41 }
 0x140   :  { %2080 = vmatprep.subr.bf16.mxu1 %v2079_v27 }
 0x142   :  { %1773 = vmatmul.mubr.f32.vlgmr.msra.gmra.mrb[2].mxu1 %v220_v21 }
 0x143   :  { %2082 = vmatpush3.bf16.msra.mxu1 %v2081_v30  ;;  %v624_v30 = vld [vmem:[%s2939_s2 + $0x120] sm:$0xff] }
 0x144   :  { %2084 = vmatprep.subr.bf16.mxu1 %v2083_v36  ;;  %v2119_v33 = vpack.c.bf16 %v625_v31, %v624_v30  ;;  %v627_v36 = vld [vmem:[%s2939_s2 + $0x138] sm:$0xff]  ;;  %v523_v30 = vlaneseq }
 0x145   :  { %v2123_v37 = vpack.c.bf16 %v627_v36, %v626_v34 }
 0x146   :  { %v524_v31 = vshrl.u32 %v523_v30, 7 }
 0x147   :  { %2086 = vmatpush3.bf16.msra.mxu1 %v2085_v39  ;;  %v612_v39 = vld [vmem:[%s2939_s2 + $0xc0] sm:$0xff] }
 0x148   :  { %2088 = vmatprep.subr.bf16.mxu1 %v2087_v48  ;;  %v2095_v47 = vpack.c.bf16 %v613_v40, %v612_v39  ;;  %v596_v48 = vld [vmem:[%s2939_s2 + $0x40] sm:$0xff]  ;;  %v545_v54 = vadd.s32 8, %v524_v31  ;;  %vm576_vm4 = vcmp.ge.s32.totalorder %v524_v31, 1 }
 0x14a   :  { %vm583_vm6 = vcmp.le.s32.totalorder %v545_v54, 14 }
 0x14b   :  { %2090 = vmatpush3.bf16.msra.mxu1 %v2089_v53  ;;  %v2097_v53 = vpack.c.bf16 %v597_v49, %v596_v48 }
 0x14c   :  { %2092 = vmatprep.subr.bf16.mxu1 %v2091_v56  ;;  %v614_v56 = vld [vmem:[%s2939_s2 + $0xd0] sm:$0xff] }
 0x14d   :  { %v2099_v59 = vpack.c.bf16 %v615_v58, %v614_v56 }
 0x14f   :  { %2094 = vmatpush3.bf16.msra.mxu1 %v2093_v61  ;;  %v598_v61 = vld [vmem:[%s2939_s2 + $0x50] sm:$0xff] }
 0x150   :  { %2096 = vmatprep.subr.bf16.mxu1 %v2095_v47 }
 0x153   :  { %2098 = vmatpush3.bf16.msra.mxu1 %v2097_v53 }
 0x154   :  { %2100 = vmatprep.subr.bf16.mxu1 %v2099_v59 }
 0x1f5   :  { %v287_v62 = vpop.f32.mrb[0].mxu1 }
 0x1f6   :  { %v1739_v63 = vpop.f32.mrb[1].mxu1  ;;  %v291_v0 = vmul.f32 0.001953125, %v287_v62  ;;  %v599_v62 = vld [vmem:[%s2939_s2 + $0x58] sm:$0xff] }
 0x1f7   :  { %v630_v63 = vld [vmem:[%s2939_s2 + $0x150] sm:$0xff] }
 0x1f8   :  { %v363_v4 = vmul.f32 %v291_v0, %v291_v0  ;;  %v443_v16 = vmul.f32 %v291_v0, %v2663_v13  ;;  %v2101_v0 = vpack.c.bf16 %v599_v62, %v598_v61 }
 0x1fa   :  { %2102 = vmatpush3.bf16.msra.mxu1 %v2101_v0 }
 0x215   :  { %v358_v2 = vpop.f32.mrb[2].mxu1 }
 0x216   :  { %v362_v7 = vmul.f32 0.001953125, %v358_v2  ;;  %v1774_v8 = vpop.f32.mrb[3].mxu1  ;;  %v631_v2 = vld [vmem:[%s2939_s2 + $0x158] sm:$0xff] }
 0x217   :  { %v617_v8 = vld [vmem:[%s2939_s2 + $0xe8] sm:$0xff] }
 0x218   :  { %v364_v9 = vsub.f32 %v362_v7, %v363_v4  ;;  %v2131_v4 = vpack.c.bf16 %v631_v2, %v630_v63  ;;  %v616_v7 = vld [vmem:[%s2939_s2 + $0xe0] sm:$0xff] }
 0x21a   :  { %v365_v11 = vmax.f32 %v364_v9, 0.0  ;;  %v2103_v9 = vpack.c.bf16 %v617_v8, %v616_v7 }
 0x21c   :  { %v366_v12 = vadd.f32 1e-05, %v365_v11  ;;  %v600_v11 = vld [vmem:[%s2939_s2 + $0x60] sm:$0xff]  ;;  %2104 = vmatprep.subr.bf16.mxu1 %v2103_v9 }
 0x21e   :  { %2242 = vrsqrt.f32 %v366_v12  ;;  %v601_v12 = vld [vmem:[%s2939_s2 + $0x68] sm:$0xff] }
 0x21f   :  { %v2105_v15 = vpack.c.bf16 %v601_v12, %v600_v11 }
 0x221   :  { %2106 = vmatpush3.bf16.msra.mxu1 %v2105_v15 }
 0x228   :  { %v2243_v17 = vpop.eup %2242 }
 0x229   :  { %v368_v18 = vmul.f32 %v2243_v17, %v2663_v13  ;;  %v444_v19 = vmul.f32 %v2243_v17, %v443_v16  ;;  %v633_v16 = vld [vmem:[%s2939_s2 + $0x168] sm:$0xff] }
 0x22a   :  { %v2135_v17 = vpack.c.bf16 %v633_v16, %v632_v14 }
 0x22b   :  { %1778 = vmatmul.mubr.msk.f32.vlgmr.msra.gmra.mrb[8].mxu0 %vm369_vm2, %v368_v18  ;;  %v446_v21 = vrot.slane %v444_v19, 7  ;;  %v618_v18 = vld [vmem:[%s2939_s2 + $0xf0] sm:$0xff]  ;;  %v619_v19 = vld [vmem:[%s2939_s2 + $0xf8] sm:$0xff] }
 0x22c   :  { %1781 = vmatpush3.msra.mxu0 %v2608_v22  ;;  %1782 = vmatprep.mubr.msk.f32.mxu0 %vm2249_vm1, %v2250_v42 }
 0x22d   :  { %v448_v25 = vsub.f32 %v2663_v13, %v446_v21  ;;  %2112 = vmatprep.subr.bf16.mxu0 %v2111_v20  ;;  %v602_v21 = vld [vmem:[%s2939_s2 + $0x70] sm:$0xff] }
 0x22f   :  { %v450_v27 = vrot.slane %v448_v25, 1  ;;  %v2109_v25 = vpack.c.bf16 %v603_v23, %v602_v21 }
 0x231   :  { %1783 = vmatmul.mubr.msk.f32.vlgmr.msra.gmra.mrb[10].mxu0 %vm369_vm2, %v450_v27  ;;  %v635_v27 = vld [vmem:[%s2939_s2 + $0x178] sm:$0xff] }
 0x232   :  { %2114 = vmatpush3.bf16.msra.mxu0 %v2111_v20  ;;  %v2107_v20 = vpack.c.bf16 %v619_v19, %v618_v18 }
 0x233   :  { %2116 = vmatprep.subr.bf16.mxu0 %v2115_v28 }
 0x234   :  { %2108 = vmatprep.subr.bf16.mxu1 %v2107_v20 }
 0x235   :  { %2110 = vmatpush3.bf16.msra.mxu1 %v2109_v25 }
 0x236   :  { %2118 = vmatpush3.bf16.msra.mxu0 %v2115_v28  ;;  %v2139_v28 = vpack.c.bf16 %v635_v27, %v634_v24  ;;  %2143 = vmatprep.subr.bf16.mxu1 %v2248_v3 }
 0x237   :  { %2120 = vmatprep.subr.bf16.mxu0 %v2119_v33 }
 0x23a   :  { %2122 = vmatpush3.bf16.msra.mxu0 %v2119_v33  ;;  %v2771_v33 = vsub.s32 0, %v524_v31 }
 0x23b   :  { %2124 = vmatprep.subr.bf16.mxu0 %v2123_v37 }
 0x23e   :  { %2126 = vmatpush3.bf16.msra.mxu0 %v2123_v37 }
 0x23f   :  { %2128 = vmatprep.subr.bf16.mxu0 %v2127_v55 }
 0x242   :  { %2130 = vmatpush3.bf16.msra.mxu0 %v2127_v55 }
 0x243   :  { %2132 = vmatprep.subr.bf16.mxu0 %v2131_v4 }
 0x246   :  { %2134 = vmatpush3.bf16.msra.mxu0 %v2131_v4 }
 0x247   :  { %2136 = vmatprep.subr.bf16.mxu0 %v2135_v17 }
 0x24a   :  { %2138 = vmatpush3.bf16.msra.mxu0 %v2135_v17 }
 0x24b   :  { %2140 = vmatprep.subr.bf16.mxu0 %v2139_v28 }
 0x24e   :  { %2142 = vmatpush3.bf16.msra.mxu0 %v2139_v28 }
 0x24f   :  { %2167 = vmatprep.subr.bf16.mxu0 %v2248_v3 }
 0x2fe   :  { %v439_v34 = vpop.f32.mrb[8].mxu0 }
 0x2ff   :  { %v526_v36 = vrot.slane %v439_v34, %v2771_v33  ;;  %v1779_v37 = vpop.f32.mrb[9].mxu0 }
 0x301   :  { %v528_v39 = vmul.f32 %v526_v36, %v2548_v46  ;;  %v529_v40 = vmul.f32 %v526_v36, %v2564_v57  ;;  %v530_v47 = vmul.f32 %v526_v36, %v2574_v1  ;;  %v527_v48 = vmul.f32 %v526_v36, %v2544_v43 }
 0x304   :  { %v519_v49 = vpop.f32.mrb[10].mxu0 }
 0x305   :  { %v534_v52 = vrot.slane %v519_v49, %v2771_v33  ;;  %v1784_v53 = vpop.f32.mrb[11].mxu0 }
 0x307   :  { %v536_v55 = vadd.f32 %v534_v52, %v528_v39  ;;  %v537_v56 = vadd.f32 %v534_v52, %v529_v40  ;;  %v538_v58 = vadd.f32 %v534_v52, %v530_v47  ;;  %v535_v59 = vadd.f32 %v534_v52, %v527_v48 }
 0x309   :  { %v540_v61 = vmax.f32 %v536_v55, 0.0  ;;  %v541_v62 = vmax.f32 %v537_v56, 0.0  ;;  %v542_v63 = vmax.f32 %v538_v58, 0.0  ;;  %v539_v0 = vmax.f32 %v535_v59, 0.0 }
 0x30b   :  { %700 = vmatprep.mubr.f32.mxu1 %v539_v0  ;;  %v551_v46 = vrot.slane %v539_v0, 7  ;;  %v564_v43 = vrot.slane %v539_v0, 1  ;;  %v565_v57 = vrot.slane %v540_v61, 1  ;;  %v567_v1 = vrot.slane %v541_v62, 1 }
 0x30c   :  { %v569_v2 = vrot.slane %v542_v63, 1  ;;  %v552_v4 = vrot.slane %v540_v61, 7  ;;  %v554_v7 = vrot.slane %v541_v62, 7  ;;  %v556_v8 = vrot.slane %v542_v63, 7 }
 0x30d   :  { %v562_v9 = vsel %vm550_vm3, 0.0, %v551_v46  ;;  %v566_v11 = vsel %vm563_vm5, %v564_v43, %v565_v57  ;;  %v568_v12 = vsel %vm563_vm5, %v565_v57, %v567_v1 }
 0x30e   :  { %1519 = vmatmul.mubr.msk.f32.vlgmr.msra.gmra.mrb[4].mxu1 %vm576_vm4, %v562_v9  ;;  %1817 = vmatprep.mubr.f32.mxu0 %v566_v11  ;;  %v570_v14 = vsel %vm563_vm5, %v567_v1, %v569_v2  ;;  %v553_v15 = vsel %vm550_vm3, %v551_v46, %v552_v4  ;;  %v555_v16 = vsel %vm550_vm3, %v552_v4, %v554_v7  ;;  %v575_v18 = vsel %vm563_vm5, %v569_v2, 0.0 }
 0x30f   :  { %705 = vmatprep.mubr.f32.mxu1 %v540_v61  ;;  %1818 = vmatmul.mubr.msk.f32.vlgmr.msra.gmra.mrb[12].mxu0 %vm583_vm6, %v568_v12  ;;  %v557_v17 = vsel %vm550_vm3, %v554_v7, %v556_v8 }
 0x310   :  { %1820 = vmatprep.mubr.f32.mxu0 %v570_v14  ;;  %2145 = vmatpush3.bf16.msra.mxu1 %v2381_v44 }
 0x311   :  { %2169 = vmatpush3.bf16.msra.mxu0 %v2381_v44  ;;  %2146 = vmatprep.subr.bf16.mxu1 %v2248_v3 }
 0x312   :  { %706 = vmatmul.mubr.f32.gmra.mrb[6].mxu1 %v553_v15  ;;  %2170 = vmatprep.subr.bf16.mxu0 %v2248_v3 }
 0x313   :  { %710 = vmatprep.mubr.f32.mxu1 %v541_v62  ;;  %1821 = vmatmul.mubr.msk.f32.gmra.mrb[14].mxu0 %vm583_vm6, %v575_v18 }
 0x314   :  { %2148 = vmatpush3.bf16.msra.mxu1 %v2396_v50  ;;  %1890 = vmatprep.mubr.msk.f32.mxu0 %vm2249_vm1, %v2250_v42 }
 0x315   :  { %2172 = vmatpush3.bf16.msra.mxu0 %v2396_v50  ;;  %2149 = vmatprep.subr.bf16.mxu1 %v2248_v3 }
 0x316   :  { %1520 = vmatmul.mubr.msk.f32.gmra.mrb[8].mxu1 %vm576_vm4, %v555_v16  ;;  %2173 = vmatprep.subr.bf16.mxu0 %v2248_v3 }
 0x317   :  { %715 = vmatprep.mubr.f32.mxu1 %v542_v63 }
 0x318   :  { %2151 = vmatpush3.bf16.msra.mxu1 %v2485_v26 }
 0x319   :  { %2175 = vmatpush3.bf16.msra.mxu0 %v2485_v26  ;;  %2152 = vmatprep.subr.bf16.mxu1 %v2248_v3 }
 0x31a   :  { %716 = vmatmul.mubr.f32.gmra.mrb[10].mxu1 %v557_v17  ;;  %2176 = vmatprep.subr.bf16.mxu0 %v2248_v3 }
 0x31b   :  { %1855 = vmatprep.mubr.msk.f32.mxu1 %vm2249_vm1, %v2250_v42 }
 0x31c   :  { %2154 = vmatpush3.bf16.msra.mxu1 %v2495_v29 }
 0x31d   :  { %2178 = vmatpush3.bf16.msra.mxu0 %v2495_v29  ;;  %2155 = vmatprep.subr.bf16.mxu1 %v2248_v3 }
 0x31e   :  { %2179 = vmatprep.subr.bf16.mxu0 %v2248_v3 }
 0x320   :  { %2157 = vmatpush3.bf16.msra.mxu1 %v2505_v32 }
 0x321   :  { %2181 = vmatpush3.bf16.msra.mxu0 %v2505_v32  ;;  %2158 = vmatprep.subr.bf16.mxu1 %v2248_v3 }
 0x322   :  { %2182 = vmatprep.subr.bf16.mxu0 %v2248_v3 }
 0x324   :  { %2160 = vmatpush3.bf16.msra.mxu1 %v2515_v35 }
 0x325   :  { %2184 = vmatpush3.bf16.msra.mxu0 %v2515_v35  ;;  %2161 = vmatprep.subr.bf16.mxu1 %v2248_v3 }
 0x326   :  { %2185 = vmatprep.subr.bf16.mxu0 %v2248_v3 }
 0x328   :  { %2163 = vmatpush3.bf16.msra.mxu1 %v2525_v38 }
 0x329   :  { %2187 = vmatpush3.bf16.msra.mxu0 %v2525_v38  ;;  %2164 = vmatprep.subr.bf16.mxu1 %v2248_v3 }
 0x32a   :  { %2188 = vmatprep.subr.bf16.mxu0 %v2248_v3 }
 0x32c   :  { %2166 = vmatpush3.bf16.msra.mxu1 %v2535_v41 }
 0x32d   :  { %2190 = vmatpush3.bf16.msra.mxu0 %v2535_v41  ;;  %1893 = vmatprep.subr.mxu1 %v2250_v42 }
 0x32e   :  { %1898 = vmatprep.subr.mxu0 %v2250_v42 }
 0x3e1   :  { %v1597_v19 = vpop.f32.mrb[4].mxu1 }
 0x3e2   :  { %v1598_v20 = vpop.f32.mrb[5].mxu1  ;;  %v1819_v21 = vpop.f32.mrb[12].mxu0 }
 0x3e3   :  { %v1599_v23 = vadd.f32 %v1598_v20, %v1597_v19  ;;  %v787_v24 = vpop.f32.mrb[13].mxu0 }
 0x3e5   :  { %v2827_v25 = vadd.f32 %v1599_v23, %v787_v24  ;;  %v1600_v27 = vpop.f32.mrb[6].mxu1 }
 0x3e6   :  { %v1601_v28 = vpop.f32.mrb[7].mxu1  ;;  %v1822_v30 = vpop.f32.mrb[14].mxu0 }
 0x3e7   :  { %v1602_v31 = vadd.f32 %v1601_v28, %v1600_v27  ;;  %v797_v34 = vpop.f32.mrb[15].mxu0  ;;  %v815_v53 = vmul.f32 %v2827_v25, %v2827_v25 }
 0x3e9   :  { %v2829_v36 = vadd.f32 %v1819_v21, %v1602_v31  ;;  %v1603_v37 = vpop.f32.mrb[8].mxu1 }
 0x3ea   :  { %v1604_v39 = vpop.f32.mrb[9].mxu1 }
 0x3eb   :  { %v1605_v40 = vadd.f32 %v1604_v39, %v1603_v37  ;;  %v816_v47 = vmul.f32 %v2829_v36, %v2829_v36  ;;  %v806_v54 = vadd.f32 %v2829_v36, %v2827_v25 }
 0x3ed   :  { %v2833_v48 = vadd.f32 %v1605_v40, %v797_v34  ;;  %v1606_v49 = vpop.f32.mrb[10].mxu1  ;;  %v819_v58 = vadd.f32 %v816_v47, %v815_v53 }
 0x3ee   :  { %v1607_v52 = vpop.f32.mrb[11].mxu1 }
 0x3ef   :  { %v817_v55 = vmul.f32 %v2833_v48, %v2833_v48  ;;  %v1608_v56 = vadd.f32 %v1607_v52, %v1606_v49  ;;  %v807_v59 = vadd.f32 %v806_v54, %v2833_v48  ;;  %v1159_v54 = vrot.slane %v2582_v6, 4 }
 0x3f1   :  { %v2842_v61 = vadd.f32 %v1822_v30, %v1608_v56  ;;  %v820_v62 = vadd.f32 %v819_v58, %v817_v55  ;;  %v1054_v30 = vrot.slane %v2663_v13, 2  ;;  %v1160_v55 = vadd.f32 %v1159_v54, %v2582_v6 }
 0x3f3   :  { %v808_v63 = vadd.f32 %v807_v59, %v2842_v61  ;;  %v818_v0 = vmul.f32 %v2842_v61, %v2842_v61  ;;  %v1161_v56 = vrot.slane %v1160_v55, 2 }
 0x3f5   :  { %v809_v46 = vrot.slane %v808_v63, 4  ;;  %v821_v43 = vadd.f32 %v820_v62, %v818_v0  ;;  %v1162_v6 = vadd.f32 %v1161_v56, %v1160_v55 }
 0x3f7   :  { %v810_v57 = vadd.f32 %v809_v46, %v808_v63  ;;  %v822_v1 = vrot.slane %v821_v43, 4 }
 0x3f9   :  { %v811_v2 = vrot.slane %v810_v57, 2  ;;  %v823_v4 = vadd.f32 %v822_v1, %v821_v43 }
 0x3fb   :  { %v812_v7 = vadd.f32 %v811_v2, %v810_v57  ;;  %v824_v8 = vrot.slane %v823_v4, 2 }
 0x3fd   :  { %v813_v9 = vrot.slane %v812_v7, 1  ;;  %v825_v11 = vadd.f32 %v824_v8, %v823_v4 }
 0x3ff   :  { %v814_v12 = vadd.f32 %v813_v9, %v812_v7  ;;  %v826_v14 = vrot.slane %v825_v11, 1 }
 0x401   :  { %1856 = vmatmul.mubr.f32.vlgmr.msra.gmra.mrb[12].mxu1 %v814_v12  ;;  %v827_v15 = vadd.f32 %v826_v14, %v825_v11 }
 0x402   :  { %1894 = vmatpush3.msra.mxu1 %v2608_v22  ;;  %1895 = vmatprep.mubr.msk.f32.mxu1 %vm2249_vm1, %v2250_v42 }
 0x403   :  { %1891 = vmatmul.mubr.f32.vlgmr.msra.gmra.mrb[16].mxu0 %v827_v15  ;;  %2191 = vmatprep.subr.bf16.mxu1 %v2248_v3 }
 0x404   :  { %1899 = vmatpush3.msra.mxu0 %v2608_v22  ;;  %1900 = vmatprep.mubr.msk.f32.mxu0 %vm2249_vm1, %v2250_v42 }
 0x405   :  { %2215 = vmatprep.subr.bf16.mxu0 %v2248_v3 }
 0x4d4   :  { %v894_v16 = vpop.f32.mrb[12].mxu1 }
 0x4d5   :  { %v898_v17 = vmul.f32 0.001953125, %v894_v16  ;;  %v1857_v18 = vpop.f32.mrb[13].mxu1 }
 0x4d6   :  { %v965_v19 = vpop.f32.mrb[16].mxu0 }
 0x4d7   :  { %v970_v20 = vmul.f32 %v898_v17, %v898_v17  ;;  %v969_v21 = vmul.f32 0.001953125, %v965_v19  ;;  %v1892_v23 = vpop.f32.mrb[17].mxu0  ;;  %v1056_v31 = vmul.f32 %v1054_v30, %v898_v17 }
 0x4d9   :  { %v971_v24 = vsub.f32 %v969_v21, %v970_v20 }
 0x4db   :  { %v972_v27 = vmax.f32 %v971_v24, 0.0 }
 0x4dd   :  { %v973_v28 = vadd.f32 1e-05, %v972_v27 }
 0x4df   :  { %2244 = vrsqrt.f32 %v973_v28 }
 0x4e9   :  { %v2245_v34 = vpop.eup %2244 }
 0x4ea   :  { %v976_v37 = vrot.slane %v2245_v34, 6  ;;  %v1057_v39 = vmul.f32 %v2245_v34, %v1056_v31 }
 0x4ec   :  { %v978_v40 = vmul.f32 %v976_v37, %v2663_v13  ;;  %v1059_v47 = vrot.slane %v1057_v39, 5 }
 0x4ee   :  { %v980_v49 = vrot.slane %v978_v40, 2  ;;  %v1061_v52 = vsub.f32 %v2663_v13, %v1059_v47 }
 0x4f0   :  { %1896 = vmatmul.mubr.msk.f32.vlgmr.msra.gmra.mrb[14].mxu1 %vm369_vm2, %v980_v49  ;;  %v1063_v53 = vrot.slane %v1061_v52, 3 }
 0x4f1   :  { %2193 = vmatpush3.bf16.msra.mxu1 %v2381_v44  ;;  %1935 = vmatprep.mubr.msk.f32.mxu1 %vm2249_vm1, %v2250_v42 }
 0x4f2   :  { %1901 = vmatmul.mubr.msk.f32.vlgmr.msra.gmra.mrb[18].mxu0 %vm369_vm2, %v1063_v53  ;;  %2194 = vmatprep.subr.bf16.mxu1 %v2248_v3 }
 0x4f3   :  { %2217 = vmatpush3.bf16.msra.mxu0 %v2381_v44  ;;  %1970 = vmatprep.mubr.msk.f32.mxu0 %vm2249_vm1, %v2250_v42  ;;  %v1172_v44 = vrot.slane %v2586_v10, 4 }
 0x4f4   :  { %2218 = vmatprep.subr.bf16.mxu0 %v2248_v3 }
 0x4f5   :  { %2196 = vmatpush3.bf16.msra.mxu1 %v2396_v50 }
 0x4f6   :  { %2197 = vmatprep.subr.bf16.mxu1 %v2248_v3 }
 0x4f7   :  { %2220 = vmatpush3.bf16.msra.mxu0 %v2396_v50  ;;  %v1173_v50 = vadd.f32 %v1172_v44, %v2586_v10  ;;  %v1163_v10 = vrot.slane %v1162_v6, 1 }
 0x4f8   :  { %2221 = vmatprep.subr.bf16.mxu0 %v2248_v3 }
 0x4f9   :  { %2199 = vmatpush3.bf16.msra.mxu1 %v2485_v26  ;;  %v1164_v58 = vadd.f32 %v1163_v10, %v1162_v6 }
 0x4fa   :  { %2200 = vmatprep.subr.bf16.mxu1 %v2248_v3 }
 0x4fb   :  { %2223 = vmatpush3.bf16.msra.mxu0 %v2485_v26  ;;  %v1174_v26 = vrot.slane %v1173_v50, 2 }
 0x4fc   :  { %2224 = vmatprep.subr.bf16.mxu0 %v2248_v3 }
 0x4fd   :  { %2202 = vmatpush3.bf16.msra.mxu1 %v2495_v29 }
 0x4fe   :  { %2203 = vmatprep.subr.bf16.mxu1 %v2248_v3 }
 0x4ff   :  { %2226 = vmatpush3.bf16.msra.mxu0 %v2495_v29  ;;  %v1175_v29 = vadd.f32 %v1174_v26, %v1173_v50 }
 0x500   :  { %2227 = vmatprep.subr.bf16.mxu0 %v2248_v3 }
 0x501   :  { %2205 = vmatpush3.bf16.msra.mxu1 %v2505_v32 }
 0x502   :  { %2206 = vmatprep.subr.bf16.mxu1 %v2248_v3 }
 0x503   :  { %2229 = vmatpush3.bf16.msra.mxu0 %v2505_v32  ;;  %v1176_v32 = vrot.slane %v1175_v29, 1 }
 0x504   :  { %2230 = vmatprep.subr.bf16.mxu0 %v2248_v3 }
 0x505   :  { %2208 = vmatpush3.bf16.msra.mxu1 %v2515_v35 }
 0x506   :  { %2209 = vmatprep.subr.bf16.mxu1 %v2248_v3 }
 0x507   :  { %2232 = vmatpush3.bf16.msra.mxu0 %v2515_v35  ;;  %v1177_v35 = vadd.f32 %v1176_v32, %v1175_v29 }
 0x508   :  { %2233 = vmatprep.subr.bf16.mxu0 %v2248_v3 }
 0x509   :  { %2211 = vmatpush3.bf16.msra.mxu1 %v2525_v38 }
 0x50a   :  { %2212 = vmatprep.subr.bf16.mxu1 %v2248_v3 }
 0x50b   :  { %2235 = vmatpush3.bf16.msra.mxu0 %v2525_v38 }
 0x50c   :  { %2236 = vmatprep.subr.bf16.mxu0 %v2248_v3 }
 0x50d   :  { %2214 = vmatpush3.bf16.msra.mxu1 %v2535_v41 }
 0x50e   :  { %1973 = vmatprep.subr.mxu1 %v2250_v42 }
 0x50f   :  { %2238 = vmatpush3.bf16.msra.mxu0 %v2535_v41 }
 0x510   :  { %1936 = vmatmul.mubr.f32.vlgmr.msra.gmra.mrb[16].mxu1 %v1164_v58  ;;  %1978 = vmatprep.subr.mxu0 %v2250_v42 }
 0x511   :  { %1974 = vmatpush3.msra.mxu1 %v2608_v22  ;;  %1975 = vmatprep.mubr.msk.f32.mxu1 %vm2249_vm1, %v2250_v42 }
 0x512   :  { %1971 = vmatmul.mubr.f32.vlgmr.msra.gmra.mrb[20].mxu0 %v1177_v35 }
 0x513   :  { %1979 = vmatpush3.msra.mxu0 %v2608_v22  ;;  %1980 = vmatprep.mubr.msk.f32.mxu0 %vm2249_vm1, %v2250_v42 }
 0x5c3   :  { %v1049_v3 = vpop.f32.mrb[14].mxu1 }
 0x5c4   :  { %v1139_v38 = vrot.slane %v1049_v3, %v2771_v33  ;;  %v1897_v59 = vpop.f32.mrb[15].mxu1 }
 0x5c5   :  { %v1132_v41 = vpop.f32.mrb[18].mxu0 }
 0x5c6   :  { %v1140_v62 = vmul.f32 %v1139_v38, %v2827_v25  ;;  %v1141_v63 = vmul.f32 %v1139_v38, %v2829_v36  ;;  %v1142_v0 = vmul.f32 %v1139_v38, %v2833_v48  ;;  %v1143_v46 = vmul.f32 %v1139_v38, %v2842_v61  ;;  %v1902_v43 = vpop.f32.mrb[19].mxu0 }
 0x5c7   :  { %v1147_v57 = vrot.slane %v1132_v41, %v2771_v33  ;;  %v1403_v48 = vrot.slane %v2663_v13, 4 }
 0x5c9   :  { %v1148_v22 = vadd.f32 %v1147_v57, %v1140_v62  ;;  %v1149_v1 = vadd.f32 %v1147_v57, %v1141_v63  ;;  %v1150_v2 = vadd.f32 %v1147_v57, %v1142_v0  ;;  %v1151_v42 = vadd.f32 %v1147_v57, %v1143_v46 }
 0x5cb   :  { %v1152_v49 = vmax.f32 %v1148_v22, 0.0  ;;  %v1153_v52 = vmax.f32 %v1149_v1, 0.0  ;;  %v1154_v53 = vmax.f32 %v1150_v2, 0.0  ;;  %v1155_v54 = vmax.f32 %v1151_v42, 0.0 }
 0x5e3   :  { %v1244_v4 = vpop.f32.mrb[16].mxu1 }
 0x5e4   :  { %v1248_v7 = vmul.f32 0.001953125, %v1244_v4  ;;  %v1937_v8 = vpop.f32.mrb[17].mxu1 }
 0x5e5   :  { %v1315_v9 = vpop.f32.mrb[20].mxu0 }
 0x5e6   :  { %v1320_v11 = vmul.f32 %v1248_v7, %v1248_v7  ;;  %v1319_v12 = vmul.f32 0.001953125, %v1315_v9  ;;  %v1972_v25 = vpop.f32.mrb[21].mxu0  ;;  %v1405_v61 = vmul.f32 %v1403_v48, %v1248_v7 }
 0x5e8   :  { %v1321_v14 = vsub.f32 %v1319_v12, %v1320_v11 }
 0x5ea   :  { %v1322_v36 = vmax.f32 %v1321_v14, 0.0 }
 0x5ec   :  { %v1323_v15 = vadd.f32 1e-05, %v1322_v36 }
 0x5ee   :  { %2246 = vrsqrt.f32 %v1323_v15 }
 0x5f8   :  { %v2247_v16 = vpop.eup %2246 }
 0x5f9   :  { %v1326_v17 = vrot.slane %v2247_v16, 4  ;;  %v1406_v18 = vmul.f32 %v2247_v16, %v1405_v61 }
 0x5fb   :  { %v1328_v19 = vmul.f32 %v1326_v17, %v2663_v13  ;;  %v1408_v20 = vrot.slane %v1406_v18, 3 }
 0x5fd   :  { %v1330_v21 = vrot.slane %v1328_v19, 4  ;;  %v1410_v23 = vsub.f32 %v2663_v13, %v1408_v20 }
 0x5ff   :  { %1976 = vmatmul.mubr.msk.f32.vlgmr.msra.gmra.mrb[18].mxu1 %vm369_vm2, %v1330_v21  ;;  %v1412_v24 = vrot.slane %v1410_v23, 5 }
 0x601   :  { %1981 = vmatmul.mubr.msk.f32.vlgmr.msra.gmra.mrb[22].mxu0 %vm369_vm2, %v1412_v24 }
 0x6d2   :  { %v1399_v27 = vpop.f32.mrb[18].mxu1 }
 0x6d3   :  { %v1488_v28 = vrot.slane %v1399_v27, %v2771_v33  ;;  %v1977_v30 = vpop.f32.mrb[19].mxu1 }
 0x6d4   :  { %v1481_v31 = vpop.f32.mrb[22].mxu0 }
 0x6d5   :  { %v1489_v34 = vmul.f32 %v1488_v28, %v2546_v45  ;;  %v1490_v37 = vmul.f32 %v1488_v28, %v2556_v51  ;;  %v1491_v39 = vmul.f32 %v1488_v28, %v2569_v60  ;;  %v1492_v40 = vmul.f32 %v1488_v28, %v2579_v5  ;;  %v1982_v47 = vpop.f32.mrb[23].mxu0 }
 0x6d6   :  { %v1496_v13 = vrot.slane %v1481_v31, %v2771_v33 }
 0x6d8   :  { %v1497_v44 = vadd.f32 %v1496_v13, %v1489_v34  ;;  %v1498_v55 = vadd.f32 %v1496_v13, %v1490_v37  ;;  %v1499_v50 = vadd.f32 %v1496_v13, %v1491_v39  ;;  %v1500_v56 = vadd.f32 %v1496_v13, %v1492_v40 }
 0x6da   :  { %v1501_v26 = vadd.f32 %v1497_v44, %v1152_v49  ;;  %v1502_v6 = vadd.f32 %v1498_v55, %v1153_v52  ;;  %v1503_v45 = vadd.f32 %v1499_v50, %v1154_v53  ;;  %v1504_v29 = vadd.f32 %v1500_v56, %v1155_v54 }
 0x6dc   :  { %1505 = vst [vmem:[%s2941_s6] sm:$0xff] %v1501_v26  ;;  %1506 = vst [vmem:[%s2941_s6 + $0x8] sm:$0xff] %v1502_v6 }
 0x6dd   :  { %1507 = vst [vmem:[%s2941_s6 + $0x10] sm:$0xff] %v1503_v45  ;;  %1508 = vst [vmem:[%s2941_s6 + $0x18] sm:$0xff] %v1504_v29 }

</bundles_post_ra>
